<compile_context>
chip_gen: v5e
topology: v5e:2x2
jax: 0.10.0
libtpu: 0.0.40
codegen_flags: <defaults>
</compile_context>

<pallas_src>
import functools
import math

import jax
import jax.numpy as jnp
from jax import lax
from jax.experimental import pallas as pl
from jax.experimental.pallas import tpu as pltpu


# ----------------------------------------------------------------------------
# Kernels
# ----------------------------------------------------------------------------

def _mxu(a, b):
    """MXU dot: bf16 operands, f32 accumulation."""
    return jnp.dot(a.astype(jnp.bfloat16), b.astype(jnp.bfloat16),
                   preferred_element_type=jnp.float32)


def _layer_norm(y, g_ref, b_ref):
    """Row-wise LayerNorm over last dim, f32 math, torch eps=1e-5."""
    mu = jnp.mean(y, axis=-1, keepdims=True)
    var = jnp.mean((y - mu) * (y - mu), axis=-1, keepdims=True)
    yn = (y - mu) * lax.rsqrt(var + 1e-5)
    return yn * g_ref[...].astype(jnp.float32) + b_ref[...].astype(jnp.float32)


def _encoder_layer_kernel(x_ref, pos_ref,
                          wqk_ref, bqk_ref, wv_ref, bv_ref, wo_ref, bo_ref,
                          g1_ref, be1_ref,
                          w1_ref, b1_ref, w2_ref, b2_ref,
                          g2_ref, be2_ref,
                          o_ref, *, nhead, scale):
    """One full post-norm encoder layer for one batch element (block (1,L,D))."""
    f32 = jnp.float32
    x = x_ref[0].astype(f32)                      # (L, D)
    qk_in = x + pos_ref[0].astype(f32)            # q = k = src + pos
    L, D = x.shape
    Dh = D // nhead

    # ---- fused Q|K projection (one dot) + V projection --------------------
    qk = _mxu(qk_in, wqk_ref[...]) + bqk_ref[...].astype(f32)     # (L, 2D)
    v = _mxu(x, wv_ref[...]) + bv_ref[...].astype(f32)            # (L, D)
    q = qk[:, :D]
    k = qk[:, D:]

    # ---- multi-head attention with fused output projection ----------------
    # out-proj is folded into the (static, unrolled) head loop:
    #   attn @ Wo == sum_h O_h @ Wo[h*Dh:(h+1)*Dh, :]
    # so the accumulator stays lane-dense (L, D); no narrow (L, Dh) stores.
    acc = jnp.zeros((L, D), f32)
    for h in range(nhead):
        sl = slice(h * Dh, (h + 1) * Dh)
        qh, kh, vh = q[:, sl], k[:, sl], v[:, sl]
        s = lax.dot_general(qh, kh, (((1,), (1,)), ((), ())),
                            preferred_element_type=f32) * scale    # (L, L)
        s = s - jnp.max(s, axis=-1, keepdims=True)
        p = jnp.exp(s)
        p = p * pl.reciprocal(jnp.sum(p, axis=-1, keepdims=True), approx=True)
        oh = _mxu(p, vh)                                           # (L, Dh)
        acc = acc + _mxu(oh, wo_ref[sl, :])                        # fold out-proj
    sa = acc + bo_ref[...].astype(f32)

    # ---- residual + LayerNorm1 (fused) -------------------------------------
    x1 = _layer_norm(x + sa, g1_ref, be1_ref)

    # ---- fused FFN: linear2(relu(linear1(x1))) + residual + LayerNorm2 -----
    h1 = jnp.maximum(_mxu(x1, w1_ref[...]) + b1_ref[...].astype(f32), 0.0)  # (L, FF) stays on-chip
    ff = _mxu(h1, w2_ref[...]) + b2_ref[...].astype(f32)
    x2 = _layer_norm(x1 + ff, g2_ref, be2_ref)

    o_ref[0] = x2.astype(o_ref.dtype)


def _final_norm_kernel(x_ref, g_ref, b_ref, o_ref):
    o_ref[0] = _layer_norm(x_ref[0].astype(jnp.float32), g_ref, b_ref).astype(o_ref.dtype)


# ----------------------------------------------------------------------------
# pallas_call wrappers
# ----------------------------------------------------------------------------

def _full_spec(shape):
    return pl.BlockSpec(shape, lambda b: (0,) * len(shape))


def encoder_layer_pallas(x, pos, p, nhead):
    """x, pos: (B, L, D) batch-first.  One fused pallas_call per layer."""
    B, L, D = x.shape
    FF = p["w1"].shape[1]
    assert D % nhead == 0
    scale = 1.0 / math.sqrt(D // nhead)

    seq_spec = pl.BlockSpec((1, L, D), lambda b: (b, 0, 0))
    kernel = functools.partial(_encoder_layer_kernel, nhead=nhead, scale=scale)

    return pl.pallas_call(
        kernel,
        out_shape=jax.ShapeDtypeStruct((B, L, D), x.dtype),
        grid=(B,),
        in_specs=[
            seq_spec, seq_spec,
            _full_spec((D, 2 * D)), _full_spec((1, 2 * D)),   # wqk, bqk
            _full_spec((D, D)), _full_spec((1, D)),           # wv, bv
            _full_spec((D, D)), _full_spec((1, D)),           # wo, bo
            _full_spec((1, D)), _full_spec((1, D)),           # ln1 gamma/beta
            _full_spec((D, FF)), _full_spec((1, FF)),         # w1, b1
            _full_spec((FF, D)), _full_spec((1, D)),          # w2, b2
            _full_spec((1, D)), _full_spec((1, D)),           # ln2 gamma/beta
        ],
        out_specs=seq_spec,
        compiler_params=pltpu.CompilerParams(
            dimension_semantics=("parallel",)),                # shard batch across TCs (v7x)
    )(x, pos,
      p["wqk"], p["bqk"], p["wv"], p["bv"], p["wo"], p["bo"],
      p["ln1_g"], p["ln1_b"],
      p["w1"], p["b1"], p["w2"], p["b2"],
      p["ln2_g"], p["ln2_b"])


def final_norm_pallas(x, gamma, beta):
    B, L, D = x.shape
    seq_spec = pl.BlockSpec((1, L, D), lambda b: (b, 0, 0))
    return pl.pallas_call(
        _final_norm_kernel,
        out_shape=jax.ShapeDtypeStruct((B, L, D), x.dtype),
        grid=(B,),
        in_specs=[seq_spec, _full_spec((1, D)), _full_spec((1, D))],
        out_specs=seq_spec,
        compiler_params=pltpu.CompilerParams(
            dimension_semantics=("parallel",)),
    )(x, gamma, beta)


# ----------------------------------------------------------------------------
# TransformerEncoder forward (stack of layers, optional final norm)
# ----------------------------------------------------------------------------

def transformer_encoder_forward(src, params, nhead, pos=None):
    """src: (L, B, D) seq-first (torch layout); returns (L, B, D).

    mask / src_key_padding_mask: None path only; dropout: identity (eval).
    """
    x = jnp.transpose(src, (1, 0, 2))                                   # (B, L, D)
    p = jnp.zeros_like(x) if pos is None else jnp.transpose(pos, (1, 0, 2))
    for layer_p in params["layers"]:
        x = encoder_layer_pallas(x, p, layer_p, nhead)
    if params.get("norm") is not None:
        x = final_norm_pallas(x, params["norm"]["gamma"], params["norm"]["beta"])
    return jnp.transpose(x, (1, 0, 2))


# ----------------------------------------------------------------------------
# Deterministic parameter construction
# ----------------------------------------------------------------------------

def make_params(key, d_model, nhead, dim_feedforward, num_layers,
                final_norm=True, dtype=jnp.float32):
    def w(k, shape, scale=0.05):
        return (scale * jax.random.normal(k, shape)).astype(dtype)

    layers = []
    for lk in jax.random.split(key, num_layers):
        ks = jax.random.split(lk, 10)
        layers.append({
            "wqk": w(ks[0], (d_model, 2 * d_model)), "bqk": w(ks[1], (1, 2 * d_model), 0.01),
            "wv": w(ks[2], (d_model, d_model)),      "bv": w(ks[3], (1, d_model), 0.01),
            "wo": w(ks[4], (d_model, d_model)),      "bo": w(ks[5], (1, d_model), 0.01),
            "w1": w(ks[6], (d_model, dim_feedforward)), "b1": w(ks[7], (1, dim_feedforward), 0.01),
            "w2": w(ks[8], (dim_feedforward, d_model)), "b2": w(ks[9], (1, d_model), 0.01),
            "ln1_g": jnp.ones((1, d_model), dtype), "ln1_b": jnp.zeros((1, d_model), dtype),
            "ln2_g": jnp.ones((1, d_model), dtype), "ln2_b": jnp.zeros((1, d_model), dtype),
        })
    params = {"layers": layers, "norm": None}
    if final_norm:
        params["norm"] = {"gamma": jnp.ones((1, d_model), dtype),
                          "beta": jnp.zeros((1, d_model), dtype)}
    return params


# ----------------------------------------------------------------------------
# Demo
# ----------------------------------------------------------------------------

if __name__ == "__main__":
    L, B = 16, 2               # sequence length, batch
    D, H, FF = 32, 4, 64       # d_model, nhead, dim_feedforward
    NUM_LAYERS = 2

    root = jax.random.PRNGKey(0)
    k_src, k_pos, k_par = jax.random.split(root, 3)

    src = jax.random.normal(k_src, (L, B, D), jnp.float32)
    pos = 0.1 * jax.random.normal(k_pos, (L, B, D), jnp.float32)

    params = make_params(k_par, D, H, FF, NUM_LAYERS, final_norm=True)

    out = transformer_encoder_forward(src, params, H, pos=pos)
    out = jax.block_until_ready(out)
    assert out.shape == (L, B, D)
    assert bool(jnp.all(jnp.isfinite(out)))
    print("KERNEL_OK")
</pallas_src>

<mosaic_0001>
module attributes {stable_mosaic.version = 11 : i64} {
  func.func @_encoder_layer_kernel(%arg0: i32, %arg1: memref<1x16x32xf32, #tpu.memory_space<vmem>>, %arg2: memref<1x16x32xf32, #tpu.memory_space<vmem>>, %arg3: memref<32x64xf32, #tpu.memory_space<vmem>>, %arg4: memref<1x64xf32, #tpu.memory_space<vmem>>, %arg5: memref<32x32xf32, #tpu.memory_space<vmem>>, %arg6: memref<1x32xf32, #tpu.memory_space<vmem>>, %arg7: memref<32x32xf32, #tpu.memory_space<vmem>>, %arg8: memref<1x32xf32, #tpu.memory_space<vmem>>, %arg9: memref<1x32xf32, #tpu.memory_space<vmem>>, %arg10: memref<1x32xf32, #tpu.memory_space<vmem>>, %arg11: memref<32x64xf32, #tpu.memory_space<vmem>>, %arg12: memref<1x64xf32, #tpu.memory_space<vmem>>, %arg13: memref<64x32xf32, #tpu.memory_space<vmem>>, %arg14: memref<1x32xf32, #tpu.memory_space<vmem>>, %arg15: memref<1x32xf32, #tpu.memory_space<vmem>>, %arg16: memref<1x32xf32, #tpu.memory_space<vmem>>, %arg17: memref<1x16x32xf32, #tpu.memory_space<vmem>>) attributes {dimension_semantics = [#tpu.dimension_semantics<parallel>], iteration_bounds = array<i64: 2>, scalar_prefetch = 0 : i64, scratch_operands = 0 : i64, tpu.core_type = #tpu.core_type<tc>, window_params = [{transform_indices = @transform_0, window_bounds = array<i64: 1, 16, 32>}, {transform_indices = @transform_1, window_bounds = array<i64: 1, 16, 32>}, {pipeline_mode = #tpu.pipeline_mode<synchronous>, transform_indices = @transform_2, window_bounds = array<i64: 32, 64>}, {pipeline_mode = #tpu.pipeline_mode<synchronous>, transform_indices = @transform_3, window_bounds = array<i64: 1, 64>}, {pipeline_mode = #tpu.pipeline_mode<synchronous>, transform_indices = @transform_4, window_bounds = array<i64: 32, 32>}, {pipeline_mode = #tpu.pipeline_mode<synchronous>, transform_indices = @transform_5, window_bounds = array<i64: 1, 32>}, {pipeline_mode = #tpu.pipeline_mode<synchronous>, transform_indices = @transform_6, window_bounds = array<i64: 32, 32>}, {pipeline_mode = #tpu.pipeline_mode<synchronous>, transform_indices = @transform_7, window_bounds = array<i64: 1, 32>}, {pipeline_mode = #tpu.pipeline_mode<synchronous>, transform_indices = @transform_8, window_bounds = array<i64: 1, 32>}, {pipeline_mode = #tpu.pipeline_mode<synchronous>, transform_indices = @transform_9, window_bounds = array<i64: 1, 32>}, {pipeline_mode = #tpu.pipeline_mode<synchronous>, transform_indices = @transform_10, window_bounds = array<i64: 32, 64>}, {pipeline_mode = #tpu.pipeline_mode<synchronous>, transform_indices = @transform_11, window_bounds = array<i64: 1, 64>}, {pipeline_mode = #tpu.pipeline_mode<synchronous>, transform_indices = @transform_12, window_bounds = array<i64: 64, 32>}, {pipeline_mode = #tpu.pipeline_mode<synchronous>, transform_indices = @transform_13, window_bounds = array<i64: 1, 32>}, {pipeline_mode = #tpu.pipeline_mode<synchronous>, transform_indices = @transform_14, window_bounds = array<i64: 1, 32>}, {pipeline_mode = #tpu.pipeline_mode<synchronous>, transform_indices = @transform_15, window_bounds = array<i64: 1, 32>}, {transform_indices = @transform_16, window_bounds = array<i64: 1, 16, 32>}]} {
    %c0 = arith.constant 0 : index
    %c0_0 = arith.constant 0 : index
    %c0_1 = arith.constant 0 : index
    %0 = vector.load %arg1[%c0, %c0_0, %c0_1] : memref<1x16x32xf32, #tpu.memory_space<vmem>>, vector<1x16x32xf32>
    %1 = vector.shape_cast %0 : vector<1x16x32xf32> to vector<16x32xf32>
    %c0_2 = arith.constant 0 : index
    %c0_3 = arith.constant 0 : index
    %c0_4 = arith.constant 0 : index
    %2 = vector.load %arg2[%c0_2, %c0_3, %c0_4] : memref<1x16x32xf32, #tpu.memory_space<vmem>>, vector<1x16x32xf32>
    %3 = vector.shape_cast %2 : vector<1x16x32xf32> to vector<16x32xf32>
    %4 = arith.addf %1, %3 : vector<16x32xf32>
    %c0_5 = arith.constant 0 : index
    %c0_6 = arith.constant 0 : index
    %5 = vector.load %arg3[%c0_5, %c0_6] : memref<32x64xf32, #tpu.memory_space<vmem>>, vector<32x64xf32>
    %6 = arith.truncf %4 : vector<16x32xf32> to vector<16x32xbf16>
    %7 = arith.truncf %5 : vector<32x64xf32> to vector<32x64xbf16>
    %cst = arith.constant dense<0.000000e+00> : vector<16x64xf32>
    %8 = tpu.matmul %6, %7, %cst {dimension_numbers = #tpu.dot_dimension_numbers<[1], [0], [0], [1], [0, 0, 1, 1], [], []>} : vector<16x32xbf16>, vector<32x64xbf16>, vector<16x64xf32> -> vector<16x64xf32>
    %c0_7 = arith.constant 0 : index
    %c0_8 = arith.constant 0 : index
    %9 = vector.load %arg4[%c0_7, %c0_8] : memref<1x64xf32, #tpu.memory_space<vmem>>, vector<1x64xf32>
    %10 = vector.broadcast %9 : vector<1x64xf32> to vector<16x64xf32>
    %11 = arith.addf %8, %10 : vector<16x64xf32>
    %c0_9 = arith.constant 0 : index
    %c0_10 = arith.constant 0 : index
    %12 = vector.load %arg5[%c0_9, %c0_10] : memref<32x32xf32, #tpu.memory_space<vmem>>, vector<32x32xf32>
    %13 = arith.truncf %1 : vector<16x32xf32> to vector<16x32xbf16>
    %14 = arith.truncf %12 : vector<32x32xf32> to vector<32x32xbf16>
    %cst_11 = arith.constant dense<0.000000e+00> : vector<16x32xf32>
    %15 = tpu.matmul %13, %14, %cst_11 {dimension_numbers = #tpu.dot_dimension_numbers<[1], [0], [0], [1], [0, 0, 1, 1], [], []>} : vector<16x32xbf16>, vector<32x32xbf16>, vector<16x32xf32> -> vector<16x32xf32>
    %c0_12 = arith.constant 0 : index
    %c0_13 = arith.constant 0 : index
    %16 = vector.load %arg6[%c0_12, %c0_13] : memref<1x32xf32, #tpu.memory_space<vmem>>, vector<1x32xf32>
    %17 = vector.broadcast %16 : vector<1x32xf32> to vector<16x32xf32>
    %18 = arith.addf %15, %17 : vector<16x32xf32>
    %19 = vector.extract_strided_slice %11 {offsets = [0, 0], sizes = [16, 32], strides = [1, 1]} : vector<16x64xf32> to vector<16x32xf32>
    %20 = vector.extract_strided_slice %11 {offsets = [0, 32], sizes = [16, 32], strides = [1, 1]} : vector<16x64xf32> to vector<16x32xf32>
    %cst_14 = arith.constant 0.000000e+00 : f32
    %21 = vector.broadcast %cst_14 : f32 to vector<16x32xf32>
    %22 = vector.extract_strided_slice %19 {offsets = [0, 0], sizes = [16, 8], strides = [1, 1]} : vector<16x32xf32> to vector<16x8xf32>
    %23 = vector.extract_strided_slice %20 {offsets = [0, 0], sizes = [16, 8], strides = [1, 1]} : vector<16x32xf32> to vector<16x8xf32>
    %24 = vector.extract_strided_slice %18 {offsets = [0, 0], sizes = [16, 8], strides = [1, 1]} : vector<16x32xf32> to vector<16x8xf32>
    %cst_15 = arith.constant dense<0.000000e+00> : vector<16x16xf32>
    %25 = tpu.matmul %22, %23, %cst_15 {dimension_numbers = #tpu.dot_dimension_numbers<[1], [1], [0], [0], [0, 0, 1, 0], [], []>} : vector<16x8xf32>, vector<16x8xf32>, vector<16x16xf32> -> vector<16x16xf32>
    %cst_16 = arith.constant 0.353553385 : f32
    %26 = vector.broadcast %cst_16 : f32 to vector<16x16xf32>
    %27 = arith.mulf %25, %26 : vector<16x16xf32>
    %cst_17 = arith.constant dense<0xFF800000> : vector<16xf32>
    %28 = vector.multi_reduction <maximumf>, %27, %cst_17 [1] : vector<16x16xf32> to vector<16xf32>
    %29 = vector.shape_cast %28 : vector<16xf32> to vector<16x1xf32>
    %30 = vector.broadcast %29 : vector<16x1xf32> to vector<16x16xf32>
    %31 = arith.subf %27, %30 : vector<16x16xf32>
    %32 = math.exp %31 : vector<16x16xf32>
    %cst_18 = arith.constant dense<0.000000e+00> : vector<16xf32>
    %33 = vector.multi_reduction <add>, %32, %cst_18 [1] : vector<16x16xf32> to vector<16xf32>
    %34 = vector.shape_cast %33 : vector<16xf32> to vector<16x1xf32>
    %35 = tpu.reciprocal %34 {approx = true} : vector<16x1xf32> -> vector<16x1xf32>
    %36 = vector.broadcast %35 : vector<16x1xf32> to vector<16x16xf32>
    %37 = arith.mulf %32, %36 : vector<16x16xf32>
    %38 = arith.truncf %37 : vector<16x16xf32> to vector<16x16xbf16>
    %39 = arith.truncf %24 : vector<16x8xf32> to vector<16x8xbf16>
    %cst_19 = arith.constant dense<0.000000e+00> : vector<16x8xf32>
    %40 = tpu.matmul %38, %39, %cst_19 {dimension_numbers = #tpu.dot_dimension_numbers<[1], [0], [0], [1], [0, 0, 1, 1], [], []>} : vector<16x16xbf16>, vector<16x8xbf16>, vector<16x8xf32> -> vector<16x8xf32>
    %c0_20 = arith.constant 0 : index
    %c0_21 = arith.constant 0 : index
    %41 = vector.load %arg7[%c0_20, %c0_21] : memref<32x32xf32, #tpu.memory_space<vmem>>, vector<8x32xf32>
    %42 = arith.truncf %40 : vector<16x8xf32> to vector<16x8xbf16>
    %43 = arith.truncf %41 : vector<8x32xf32> to vector<8x32xbf16>
    %cst_22 = arith.constant dense<0.000000e+00> : vector<16x32xf32>
    %44 = tpu.matmul %42, %43, %cst_22 {dimension_numbers = #tpu.dot_dimension_numbers<[1], [0], [0], [1], [0, 0, 1, 1], [], []>} : vector<16x8xbf16>, vector<8x32xbf16>, vector<16x32xf32> -> vector<16x32xf32>
    %45 = arith.addf %21, %44 : vector<16x32xf32>
    %46 = vector.extract_strided_slice %19 {offsets = [0, 8], sizes = [16, 8], strides = [1, 1]} : vector<16x32xf32> to vector<16x8xf32>
    %47 = vector.extract_strided_slice %20 {offsets = [0, 8], sizes = [16, 8], strides = [1, 1]} : vector<16x32xf32> to vector<16x8xf32>
    %48 = vector.extract_strided_slice %18 {offsets = [0, 8], sizes = [16, 8], strides = [1, 1]} : vector<16x32xf32> to vector<16x8xf32>
    %cst_23 = arith.constant dense<0.000000e+00> : vector<16x16xf32>
    %49 = tpu.matmul %46, %47, %cst_23 {dimension_numbers = #tpu.dot_dimension_numbers<[1], [1], [0], [0], [0, 0, 1, 0], [], []>} : vector<16x8xf32>, vector<16x8xf32>, vector<16x16xf32> -> vector<16x16xf32>
    %cst_24 = arith.constant 0.353553385 : f32
    %50 = vector.broadcast %cst_24 : f32 to vector<16x16xf32>
    %51 = arith.mulf %49, %50 : vector<16x16xf32>
    %cst_25 = arith.constant dense<0xFF800000> : vector<16xf32>
    %52 = vector.multi_reduction <maximumf>, %51, %cst_25 [1] : vector<16x16xf32> to vector<16xf32>
    %53 = vector.shape_cast %52 : vector<16xf32> to vector<16x1xf32>
    %54 = vector.broadcast %53 : vector<16x1xf32> to vector<16x16xf32>
    %55 = arith.subf %51, %54 : vector<16x16xf32>
    %56 = math.exp %55 : vector<16x16xf32>
    %cst_26 = arith.constant dense<0.000000e+00> : vector<16xf32>
    %57 = vector.multi_reduction <add>, %56, %cst_26 [1] : vector<16x16xf32> to vector<16xf32>
    %58 = vector.shape_cast %57 : vector<16xf32> to vector<16x1xf32>
    %59 = tpu.reciprocal %58 {approx = true} : vector<16x1xf32> -> vector<16x1xf32>
    %60 = vector.broadcast %59 : vector<16x1xf32> to vector<16x16xf32>
    %61 = arith.mulf %56, %60 : vector<16x16xf32>
    %62 = arith.truncf %61 : vector<16x16xf32> to vector<16x16xbf16>
    %63 = arith.truncf %48 : vector<16x8xf32> to vector<16x8xbf16>
    %cst_27 = arith.constant dense<0.000000e+00> : vector<16x8xf32>
    %64 = tpu.matmul %62, %63, %cst_27 {dimension_numbers = #tpu.dot_dimension_numbers<[1], [0], [0], [1], [0, 0, 1, 1], [], []>} : vector<16x16xbf16>, vector<16x8xbf16>, vector<16x8xf32> -> vector<16x8xf32>
    %c8 = arith.constant 8 : index
    %c0_28 = arith.constant 0 : index
    %65 = vector.load %arg7[%c8, %c0_28] : memref<32x32xf32, #tpu.memory_space<vmem>>, vector<8x32xf32>
    %66 = arith.truncf %64 : vector<16x8xf32> to vector<16x8xbf16>
    %67 = arith.truncf %65 : vector<8x32xf32> to vector<8x32xbf16>
    %cst_29 = arith.constant dense<0.000000e+00> : vector<16x32xf32>
    %68 = tpu.matmul %66, %67, %cst_29 {dimension_numbers = #tpu.dot_dimension_numbers<[1], [0], [0], [1], [0, 0, 1, 1], [], []>} : vector<16x8xbf16>, vector<8x32xbf16>, vector<16x32xf32> -> vector<16x32xf32>
    %69 = arith.addf %45, %68 : vector<16x32xf32>
    %70 = vector.extract_strided_slice %19 {offsets = [0, 16], sizes = [16, 8], strides = [1, 1]} : vector<16x32xf32> to vector<16x8xf32>
    %71 = vector.extract_strided_slice %20 {offsets = [0, 16], sizes = [16, 8], strides = [1, 1]} : vector<16x32xf32> to vector<16x8xf32>
    %72 = vector.extract_strided_slice %18 {offsets = [0, 16], sizes = [16, 8], strides = [1, 1]} : vector<16x32xf32> to vector<16x8xf32>
    %cst_30 = arith.constant dense<0.000000e+00> : vector<16x16xf32>
    %73 = tpu.matmul %70, %71, %cst_30 {dimension_numbers = #tpu.dot_dimension_numbers<[1], [1], [0], [0], [0, 0, 1, 0], [], []>} : vector<16x8xf32>, vector<16x8xf32>, vector<16x16xf32> -> vector<16x16xf32>
    %cst_31 = arith.constant 0.353553385 : f32
    %74 = vector.broadcast %cst_31 : f32 to vector<16x16xf32>
    %75 = arith.mulf %73, %74 : vector<16x16xf32>
    %cst_32 = arith.constant dense<0xFF800000> : vector<16xf32>
    %76 = vector.multi_reduction <maximumf>, %75, %cst_32 [1] : vector<16x16xf32> to vector<16xf32>
    %77 = vector.shape_cast %76 : vector<16xf32> to vector<16x1xf32>
    %78 = vector.broadcast %77 : vector<16x1xf32> to vector<16x16xf32>
    %79 = arith.subf %75, %78 : vector<16x16xf32>
    %80 = math.exp %79 : vector<16x16xf32>
    %cst_33 = arith.constant dense<0.000000e+00> : vector<16xf32>
    %81 = vector.multi_reduction <add>, %80, %cst_33 [1] : vector<16x16xf32> to vector<16xf32>
    %82 = vector.shape_cast %81 : vector<16xf32> to vector<16x1xf32>
    %83 = tpu.reciprocal %82 {approx = true} : vector<16x1xf32> -> vector<16x1xf32>
    %84 = vector.broadcast %83 : vector<16x1xf32> to vector<16x16xf32>
    %85 = arith.mulf %80, %84 : vector<16x16xf32>
    %86 = arith.truncf %85 : vector<16x16xf32> to vector<16x16xbf16>
    %87 = arith.truncf %72 : vector<16x8xf32> to vector<16x8xbf16>
    %cst_34 = arith.constant dense<0.000000e+00> : vector<16x8xf32>
    %88 = tpu.matmul %86, %87, %cst_34 {dimension_numbers = #tpu.dot_dimension_numbers<[1], [0], [0], [1], [0, 0, 1, 1], [], []>} : vector<16x16xbf16>, vector<16x8xbf16>, vector<16x8xf32> -> vector<16x8xf32>
    %c16 = arith.constant 16 : index
    %c0_35 = arith.constant 0 : index
    %89 = vector.load %arg7[%c16, %c0_35] : memref<32x32xf32, #tpu.memory_space<vmem>>, vector<8x32xf32>
    %90 = arith.truncf %88 : vector<16x8xf32> to vector<16x8xbf16>
    %91 = arith.truncf %89 : vector<8x32xf32> to vector<8x32xbf16>
    %cst_36 = arith.constant dense<0.000000e+00> : vector<16x32xf32>
    %92 = tpu.matmul %90, %91, %cst_36 {dimension_numbers = #tpu.dot_dimension_numbers<[1], [0], [0], [1], [0, 0, 1, 1], [], []>} : vector<16x8xbf16>, vector<8x32xbf16>, vector<16x32xf32> -> vector<16x32xf32>
    %93 = arith.addf %69, %92 : vector<16x32xf32>
    %94 = vector.extract_strided_slice %19 {offsets = [0, 24], sizes = [16, 8], strides = [1, 1]} : vector<16x32xf32> to vector<16x8xf32>
    %95 = vector.extract_strided_slice %20 {offsets = [0, 24], sizes = [16, 8], strides = [1, 1]} : vector<16x32xf32> to vector<16x8xf32>
    %96 = vector.extract_strided_slice %18 {offsets = [0, 24], sizes = [16, 8], strides = [1, 1]} : vector<16x32xf32> to vector<16x8xf32>
    %cst_37 = arith.constant dense<0.000000e+00> : vector<16x16xf32>
    %97 = tpu.matmul %94, %95, %cst_37 {dimension_numbers = #tpu.dot_dimension_numbers<[1], [1], [0], [0], [0, 0, 1, 0], [], []>} : vector<16x8xf32>, vector<16x8xf32>, vector<16x16xf32> -> vector<16x16xf32>
    %cst_38 = arith.constant 0.353553385 : f32
    %98 = vector.broadcast %cst_38 : f32 to vector<16x16xf32>
    %99 = arith.mulf %97, %98 : vector<16x16xf32>
    %cst_39 = arith.constant dense<0xFF800000> : vector<16xf32>
    %100 = vector.multi_reduction <maximumf>, %99, %cst_39 [1] : vector<16x16xf32> to vector<16xf32>
    %101 = vector.shape_cast %100 : vector<16xf32> to vector<16x1xf32>
    %102 = vector.broadcast %101 : vector<16x1xf32> to vector<16x16xf32>
    %103 = arith.subf %99, %102 : vector<16x16xf32>
    %104 = math.exp %103 : vector<16x16xf32>
    %cst_40 = arith.constant dense<0.000000e+00> : vector<16xf32>
    %105 = vector.multi_reduction <add>, %104, %cst_40 [1] : vector<16x16xf32> to vector<16xf32>
    %106 = vector.shape_cast %105 : vector<16xf32> to vector<16x1xf32>
    %107 = tpu.reciprocal %106 {approx = true} : vector<16x1xf32> -> vector<16x1xf32>
    %108 = vector.broadcast %107 : vector<16x1xf32> to vector<16x16xf32>
    %109 = arith.mulf %104, %108 : vector<16x16xf32>
    %110 = arith.truncf %109 : vector<16x16xf32> to vector<16x16xbf16>
    %111 = arith.truncf %96 : vector<16x8xf32> to vector<16x8xbf16>
    %cst_41 = arith.constant dense<0.000000e+00> : vector<16x8xf32>
    %112 = tpu.matmul %110, %111, %cst_41 {dimension_numbers = #tpu.dot_dimension_numbers<[1], [0], [0], [1], [0, 0, 1, 1], [], []>} : vector<16x16xbf16>, vector<16x8xbf16>, vector<16x8xf32> -> vector<16x8xf32>
    %c24 = arith.constant 24 : index
    %c0_42 = arith.constant 0 : index
    %113 = vector.load %arg7[%c24, %c0_42] : memref<32x32xf32, #tpu.memory_space<vmem>>, vector<8x32xf32>
    %114 = arith.truncf %112 : vector<16x8xf32> to vector<16x8xbf16>
    %115 = arith.truncf %113 : vector<8x32xf32> to vector<8x32xbf16>
    %cst_43 = arith.constant dense<0.000000e+00> : vector<16x32xf32>
    %116 = tpu.matmul %114, %115, %cst_43 {dimension_numbers = #tpu.dot_dimension_numbers<[1], [0], [0], [1], [0, 0, 1, 1], [], []>} : vector<16x8xbf16>, vector<8x32xbf16>, vector<16x32xf32> -> vector<16x32xf32>
    %117 = arith.addf %93, %116 : vector<16x32xf32>
    %c0_44 = arith.constant 0 : index
    %c0_45 = arith.constant 0 : index
    %118 = vector.load %arg8[%c0_44, %c0_45] : memref<1x32xf32, #tpu.memory_space<vmem>>, vector<1x32xf32>
    %119 = vector.broadcast %118 : vector<1x32xf32> to vector<16x32xf32>
    %120 = arith.addf %117, %119 : vector<16x32xf32>
    %121 = arith.addf %1, %120 : vector<16x32xf32>
    %cst_46 = arith.constant dense<0.000000e+00> : vector<16xf32>
    %122 = vector.multi_reduction <add>, %121, %cst_46 [1] : vector<16x32xf32> to vector<16xf32>
    %123 = vector.shape_cast %122 : vector<16xf32> to vector<16x1xf32>
    %cst_47 = arith.constant 3.200000e+01 : f32
    %124 = vector.broadcast %cst_47 : f32 to vector<16x1xf32>
    %125 = arith.divf %123, %124 : vector<16x1xf32>
    %126 = vector.broadcast %125 : vector<16x1xf32> to vector<16x32xf32>
    %127 = arith.subf %121, %126 : vector<16x32xf32>
    %128 = vector.broadcast %125 : vector<16x1xf32> to vector<16x32xf32>
    %129 = arith.subf %121, %128 : vector<16x32xf32>
    %130 = arith.mulf %127, %129 : vector<16x32xf32>
    %cst_48 = arith.constant dense<0.000000e+00> : vector<16xf32>
    %131 = vector.multi_reduction <add>, %130, %cst_48 [1] : vector<16x32xf32> to vector<16xf32>
    %132 = vector.shape_cast %131 : vector<16xf32> to vector<16x1xf32>
    %cst_49 = arith.constant 3.200000e+01 : f32
    %133 = vector.broadcast %cst_49 : f32 to vector<16x1xf32>
    %134 = arith.divf %132, %133 : vector<16x1xf32>
    %135 = vector.broadcast %125 : vector<16x1xf32> to vector<16x32xf32>
    %136 = arith.subf %121, %135 : vector<16x32xf32>
    %cst_50 = arith.constant 9.99999974E-6 : f32
    %137 = vector.broadcast %cst_50 : f32 to vector<16x1xf32>
    %138 = arith.addf %134, %137 : vector<16x1xf32>
    %139 = math.rsqrt %138 : vector<16x1xf32>
    %140 = vector.broadcast %139 : vector<16x1xf32> to vector<16x32xf32>
    %141 = arith.mulf %136, %140 : vector<16x32xf32>
    %c0_51 = arith.constant 0 : index
    %c0_52 = arith.constant 0 : index
    %142 = vector.load %arg9[%c0_51, %c0_52] : memref<1x32xf32, #tpu.memory_space<vmem>>, vector<1x32xf32>
    %143 = vector.broadcast %142 : vector<1x32xf32> to vector<16x32xf32>
    %144 = arith.mulf %141, %143 : vector<16x32xf32>
    %c0_53 = arith.constant 0 : index
    %c0_54 = arith.constant 0 : index
    %145 = vector.load %arg10[%c0_53, %c0_54] : memref<1x32xf32, #tpu.memory_space<vmem>>, vector<1x32xf32>
    %146 = vector.broadcast %145 : vector<1x32xf32> to vector<16x32xf32>
    %147 = arith.addf %144, %146 : vector<16x32xf32>
    %c0_55 = arith.constant 0 : index
    %c0_56 = arith.constant 0 : index
    %148 = vector.load %arg11[%c0_55, %c0_56] : memref<32x64xf32, #tpu.memory_space<vmem>>, vector<32x64xf32>
    %149 = arith.truncf %147 : vector<16x32xf32> to vector<16x32xbf16>
    %150 = arith.truncf %148 : vector<32x64xf32> to vector<32x64xbf16>
    %cst_57 = arith.constant dense<0.000000e+00> : vector<16x64xf32>
    %151 = tpu.matmul %149, %150, %cst_57 {dimension_numbers = #tpu.dot_dimension_numbers<[1], [0], [0], [1], [0, 0, 1, 1], [], []>} : vector<16x32xbf16>, vector<32x64xbf16>, vector<16x64xf32> -> vector<16x64xf32>
    %c0_58 = arith.constant 0 : index
    %c0_59 = arith.constant 0 : index
    %152 = vector.load %arg12[%c0_58, %c0_59] : memref<1x64xf32, #tpu.memory_space<vmem>>, vector<1x64xf32>
    %153 = vector.broadcast %152 : vector<1x64xf32> to vector<16x64xf32>
    %154 = arith.addf %151, %153 : vector<16x64xf32>
    %cst_60 = arith.constant 0.000000e+00 : f32
    %155 = vector.broadcast %cst_60 : f32 to vector<16x64xf32>
    %156 = arith.maximumf %154, %155 : vector<16x64xf32>
    %c0_61 = arith.constant 0 : index
    %c0_62 = arith.constant 0 : index
    %157 = vector.load %arg13[%c0_61, %c0_62] : memref<64x32xf32, #tpu.memory_space<vmem>>, vector<64x32xf32>
    %158 = arith.truncf %156 : vector<16x64xf32> to vector<16x64xbf16>
    %159 = arith.truncf %157 : vector<64x32xf32> to vector<64x32xbf16>
    %cst_63 = arith.constant dense<0.000000e+00> : vector<16x32xf32>
    %160 = tpu.matmul %158, %159, %cst_63 {dimension_numbers = #tpu.dot_dimension_numbers<[1], [0], [0], [1], [0, 0, 1, 1], [], []>} : vector<16x64xbf16>, vector<64x32xbf16>, vector<16x32xf32> -> vector<16x32xf32>
    %c0_64 = arith.constant 0 : index
    %c0_65 = arith.constant 0 : index
    %161 = vector.load %arg14[%c0_64, %c0_65] : memref<1x32xf32, #tpu.memory_space<vmem>>, vector<1x32xf32>
    %162 = vector.broadcast %161 : vector<1x32xf32> to vector<16x32xf32>
    %163 = arith.addf %160, %162 : vector<16x32xf32>
    %164 = arith.addf %147, %163 : vector<16x32xf32>
    %cst_66 = arith.constant dense<0.000000e+00> : vector<16xf32>
    %165 = vector.multi_reduction <add>, %164, %cst_66 [1] : vector<16x32xf32> to vector<16xf32>
    %166 = vector.shape_cast %165 : vector<16xf32> to vector<16x1xf32>
    %cst_67 = arith.constant 3.200000e+01 : f32
    %167 = vector.broadcast %cst_67 : f32 to vector<16x1xf32>
    %168 = arith.divf %166, %167 : vector<16x1xf32>
    %169 = vector.broadcast %168 : vector<16x1xf32> to vector<16x32xf32>
    %170 = arith.subf %164, %169 : vector<16x32xf32>
    %171 = vector.broadcast %168 : vector<16x1xf32> to vector<16x32xf32>
    %172 = arith.subf %164, %171 : vector<16x32xf32>
    %173 = arith.mulf %170, %172 : vector<16x32xf32>
    %cst_68 = arith.constant dense<0.000000e+00> : vector<16xf32>
    %174 = vector.multi_reduction <add>, %173, %cst_68 [1] : vector<16x32xf32> to vector<16xf32>
    %175 = vector.shape_cast %174 : vector<16xf32> to vector<16x1xf32>
    %cst_69 = arith.constant 3.200000e+01 : f32
    %176 = vector.broadcast %cst_69 : f32 to vector<16x1xf32>
    %177 = arith.divf %175, %176 : vector<16x1xf32>
    %178 = vector.broadcast %168 : vector<16x1xf32> to vector<16x32xf32>
    %179 = arith.subf %164, %178 : vector<16x32xf32>
    %cst_70 = arith.constant 9.99999974E-6 : f32
    %180 = vector.broadcast %cst_70 : f32 to vector<16x1xf32>
    %181 = arith.addf %177, %180 : vector<16x1xf32>
    %182 = math.rsqrt %181 : vector<16x1xf32>
    %183 = vector.broadcast %182 : vector<16x1xf32> to vector<16x32xf32>
    %184 = arith.mulf %179, %183 : vector<16x32xf32>
    %c0_71 = arith.constant 0 : index
    %c0_72 = arith.constant 0 : index
    %185 = vector.load %arg15[%c0_71, %c0_72] : memref<1x32xf32, #tpu.memory_space<vmem>>, vector<1x32xf32>
    %186 = vector.broadcast %185 : vector<1x32xf32> to vector<16x32xf32>
    %187 = arith.mulf %184, %186 : vector<16x32xf32>
    %c0_73 = arith.constant 0 : index
    %c0_74 = arith.constant 0 : index
    %188 = vector.load %arg16[%c0_73, %c0_74] : memref<1x32xf32, #tpu.memory_space<vmem>>, vector<1x32xf32>
    %189 = vector.broadcast %188 : vector<1x32xf32> to vector<16x32xf32>
    %190 = arith.addf %187, %189 : vector<16x32xf32>
    %c0_75 = arith.constant 0 : index
    %c0_76 = arith.constant 0 : index
    %c0_77 = arith.constant 0 : index
    %191 = vector.load %arg17[%c0_75, %c0_76, %c0_77] : memref<1x16x32xf32, #tpu.memory_space<vmem>>, vector<1x16x32xf32>
    %192 = vector.shape_cast %191 : vector<1x16x32xf32> to vector<16x32xf32>
    %193 = vector.shape_cast %190 : vector<16x32xf32> to vector<1x16x32xf32>
    tpu.vector_store %arg17[%c0_75, %c0_76, %c0_77], %193 {strides = array<i32>} : memref<1x16x32xf32, #tpu.memory_space<vmem>>, vector<1x16x32xf32>,
    return
  }
  func.func @transform_0(%arg0: i32) -> (i32, i32, i32) {
    %c0_i32 = arith.constant 0 : i32
    %c0_i32_0 = arith.constant 0 : i32
    %c0_i32_1 = arith.constant 0 : i32
    return %arg0, %c0_i32, %c0_i32_0 : i32, i32, i32
  }
  func.func @transform_1(%arg0: i32) -> (i32, i32, i32) {
    %c0_i32 = arith.constant 0 : i32
    %c0_i32_0 = arith.constant 0 : i32
    %c0_i32_1 = arith.constant 0 : i32
    return %arg0, %c0_i32, %c0_i32_0 : i32, i32, i32
  }
  func.func @transform_2(%arg0: i32) -> (i32, i32) {
    %c0_i32 = arith.constant 0 : i32
    %c0_i32_0 = arith.constant 0 : i32
    %c0_i32_1 = arith.constant 0 : i32
    return %c0_i32, %c0_i32_0 : i32, i32
  }
  func.func @transform_3(%arg0: i32) -> (i32, i32) {
    %c0_i32 = arith.constant 0 : i32
    %c0_i32_0 = arith.constant 0 : i32
    %c0_i32_1 = arith.constant 0 : i32
    return %c0_i32, %c0_i32_0 : i32, i32
  }
  func.func @transform_4(%arg0: i32) -> (i32, i32) {
    %c0_i32 = arith.constant 0 : i32
    %c0_i32_0 = arith.constant 0 : i32
    %c0_i32_1 = arith.constant 0 : i32
    return %c0_i32, %c0_i32_0 : i32, i32
  }
  func.func @transform_5(%arg0: i32) -> (i32, i32) {
    %c0_i32 = arith.constant 0 : i32
    %c0_i32_0 = arith.constant 0 : i32
    %c0_i32_1 = arith.constant 0 : i32
    return %c0_i32, %c0_i32_0 : i32, i32
  }
  func.func @transform_6(%arg0: i32) -> (i32, i32) {
    %c0_i32 = arith.constant 0 : i32
    %c0_i32_0 = arith.constant 0 : i32
    %c0_i32_1 = arith.constant 0 : i32
    return %c0_i32, %c0_i32_0 : i32, i32
  }
  func.func @transform_7(%arg0: i32) -> (i32, i32) {
    %c0_i32 = arith.constant 0 : i32
    %c0_i32_0 = arith.constant 0 : i32
    %c0_i32_1 = arith.constant 0 : i32
    return %c0_i32, %c0_i32_0 : i32, i32
  }
  func.func @transform_8(%arg0: i32) -> (i32, i32) {
    %c0_i32 = arith.constant 0 : i32
    %c0_i32_0 = arith.constant 0 : i32
    %c0_i32_1 = arith.constant 0 : i32
    return %c0_i32, %c0_i32_0 : i32, i32
  }
  func.func @transform_9(%arg0: i32) -> (i32, i32) {
    %c0_i32 = arith.constant 0 : i32
    %c0_i32_0 = arith.constant 0 : i32
    %c0_i32_1 = arith.constant 0 : i32
    return %c0_i32, %c0_i32_0 : i32, i32
  }
  func.func @transform_10(%arg0: i32) -> (i32, i32) {
    %c0_i32 = arith.constant 0 : i32
    %c0_i32_0 = arith.constant 0 : i32
    %c0_i32_1 = arith.constant 0 : i32
    return %c0_i32, %c0_i32_0 : i32, i32
  }
  func.func @transform_11(%arg0: i32) -> (i32, i32) {
    %c0_i32 = arith.constant 0 : i32
    %c0_i32_0 = arith.constant 0 : i32
    %c0_i32_1 = arith.constant 0 : i32
    return %c0_i32, %c0_i32_0 : i32, i32
  }
  func.func @transform_12(%arg0: i32) -> (i32, i32) {
    %c0_i32 = arith.constant 0 : i32
    %c0_i32_0 = arith.constant 0 : i32
    %c0_i32_1 = arith.constant 0 : i32
    return %c0_i32, %c0_i32_0 : i32, i32
  }
  func.func @transform_13(%arg0: i32) -> (i32, i32) {
    %c0_i32 = arith.constant 0 : i32
    %c0_i32_0 = arith.constant 0 : i32
    %c0_i32_1 = arith.constant 0 : i32
    return %c0_i32, %c0_i32_0 : i32, i32
  }
  func.func @transform_14(%arg0: i32) -> (i32, i32) {
    %c0_i32 = arith.constant 0 : i32
    %c0_i32_0 = arith.constant 0 : i32
    %c0_i32_1 = arith.constant 0 : i32
    return %c0_i32, %c0_i32_0 : i32, i32
  }
  func.func @transform_15(%arg0: i32) -> (i32, i32) {
    %c0_i32 = arith.constant 0 : i32
    %c0_i32_0 = arith.constant 0 : i32
    %c0_i32_1 = arith.constant 0 : i32
    return %c0_i32, %c0_i32_0 : i32, i32
  }
  func.func @transform_16(%arg0: i32) -> (i32, i32, i32) {
    %c0_i32 = arith.constant 0 : i32
    %c0_i32_0 = arith.constant 0 : i32
    %c0_i32_1 = arith.constant 0 : i32
    return %arg0, %c0_i32, %c0_i32_0 : i32, i32, i32
  }
}

</mosaic_0001>

<bundles_post_ra>
// kernel: tpu_custom_call.1
= control target key start
LH: loop header
LB: loop body
LE: loop exit
PB: predicated region body
PF: predicated region fallthrough
CT: control target
= control target key end

     0   :  { %s2154_s0 = inlined_call_operand.vmem [shape: f32[2,16,32], index: 0, kind: input, shape index: {}]   ;;  %s2155_s1 = inlined_call_operand.vmem [shape: f32[2,16,32], index: 1, kind: input, shape index: {}]   ;;  %s2156_s2 = inlined_call_operand.vmem [shape: f32[32,64], index: 2, kind: input, shape index: {}]   ;;  %s2157_s3 = inlined_call_operand.vmem [shape: f32[1,64], index: 3, kind: input, shape index: {}]   ;;  %s2158_s4 = inlined_call_operand.hbm [shape: f32[32,32], index: 4, kind: input, shape index: {}]   ;;  %s2159_s5 = inlined_call_operand.vmem [shape: f32[1,32], index: 5, kind: input, shape index: {}]   ;;  %s2160_s6 = inlined_call_operand.hbm [shape: f32[32,32], index: 6, kind: input, shape index: {}]   ;;  %s2161_s7 = inlined_call_operand.vmem [shape: f32[1,32], index: 7, kind: input, shape index: {}]   ;;  %s2162_s8 = inlined_call_operand.vmem [shape: f32[1,32], index: 8, kind: input, shape index: {}]   ;;  %s2163_s9 = inlined_call_operand.vmem [shape: f32[1,32], index: 9, kind: input, shape index: {}]   ;;  %s2164_s10 = inlined_call_operand.hbm [shape: f32[32,64], index: 10, kind: input, shape index: {}]   ;;  %s2165_s11 = inlined_call_operand.vmem [shape: f32[1,64], index: 11, kind: input, shape index: {}]   ;;  %s2166_s12 = inlined_call_operand.vmem [shape: f32[64,32], index: 12, kind: input, shape index: {}]   ;;  %s2167_s13 = inlined_call_operand.vmem [shape: f32[1,32], index: 13, kind: input, shape index: {}]   ;;  %s2168_s14 = inlined_call_operand.vmem [shape: f32[1,32], index: 14, kind: input, shape index: {}]   ;;  %s2169_s15 = inlined_call_operand.vmem [shape: f32[1,32], index: 15, kind: input, shape index: {}]   ;;  %s2170_s16 = inlined_call_operand.hbm [shape: f32[2,16,32], index: 16, kind: output, shape index: {}]  }
   0x1   :  { %2179 = sst [smem:[#allocation19_spill]] %s2154_s0 }
   0x2   :  { %2180 = sst [smem:[#allocation20_spill]] %s2158_s4 }
   0x3   :  { %2181 = sst [smem:[#allocation21_spill]] %s2160_s6 }
   0x4   :  { %21 = vsyncpa [#allocation3], 0 }
   0x5   :  { %22 = vsyncpa [#allocation6], 0 }
   0x6   :  { %23 = vsyncpa [#allocation4], 0 }
   0x7   :  { %25 = vsyncpa [#allocation4 + $0x1], 0  ;;  %s1849_s21 = smov 0   ;;  %s1851_s22 = smov 0  }
   0x8   :  { %s1853_s23 = smov 0   ;;  %s1855_s24 = smov 0  }
   0x9 LB: > { %2182 = sst [smem:[#allocation12_spill]] %s1735_s21  ;;  %s1870_s25 = sadd.s32 4294967295, %s1747_s24   ;;  %s1747_s24 = sphi %s1855_s24, %s2200_s24   ;;  %s1743_s23 = sphi %s1853_s23, %s2202_s23   ;;  %s1739_s22 = sphi %s1851_s22, %s2204_s22   ;;  %s1735_s21 = sphi %s1849_s21, %s2203_s21  }
   0xa   : > { %2183 = sst [smem:[#allocation13_spill]] %s1743_s23  ;;  %s1403_s26 = sadd.s32 4294967294, %s1747_s24  }
   0xb   : > { %2184 = sst [smem:[#allocation14_spill]] %s1747_s24  ;;  %s1874_s27 = sadd.s32 1, %s1747_s24  }
   0xc   : > { %2185 = sst [smem:[#allocation15_spill]] %s1874_s27  ;;  %s384_s28 = sadd.s32 1, %s1743_s23 }
   0xd   : > { %s381_s29 = ssub.s32 %s1747_s24, %s1874_s27  ;;  %p394_p0 = scmp.ne.s32.totalorder %s1743_s23, %s1739_s22 }
   0xe   : > { %p382_p1 = scmp.eq.s32.totalorder %s381_s29, 0  ;;  %p395_p2 = scmp.eq.s32.totalorder %s1870_s25, 1 }
   0xf   : > { %p400_p3 = scmp.ne.s32.totalorder %s1739_s22, %s1735_s21  ;;  %p401_p4 = scmp.eq.s32.totalorder %s1403_s26, 1 }
  0x10   : > { %s1885_s30 = scalar_select %p382_p1, %s1743_s23, %s384_s28  }
  0x11   : > { %p1887_p5 = por %p395_p2, %p394_p0  ;;  %p1891_p6 = por %p401_p4, %p400_p3 }
  0x12   : > { %2186 = sst [smem:[#allocation16_spill]] %s1885_s30  ;;  %p1404_p7 = scmp.ge.s32.totalorder %s1747_s24, 1 }
  0x13   : > { %s2187_s0 = scalar_select %p1887_p5, 1, 0 }
  0x14   : > { %s2189_s17 = scalar_select %p1891_p6, 1, 0 }
  0x15   : > { %2188 = sst [smem:[#allocation17_spill]] %s2187_s0  ;;  %p408_p8 = scmp.lt.s32.totalorder %s1747_s24, 3 }
  0x16   : > { %2190 = sst [smem:[#allocation18_spill]] %s2189_s17  ;;  %p1482_p9 = scmp.eq.s32.totalorder %s1870_s25, 0 }
  0x17   : > { %p1898_p10 = pnand %p1404_p7, %p408_p8  ;;  %s2192_s6 = sld [smem:[#allocation21_spill]] }
  0x18   : > { %s2193_s4 = sld [smem:[#allocation20_spill]]  ;;  %s1749_s27 = smov [#allocation5]  }
  0x19   : > { %p1468_p11 = pneg %p1898_p10  ;;  %s444_s17 = sshll.u32 %s1749_s27, 4  ;;  %s445_s17 = int_to_ptr.vmem [resolvable:$true] %s444_s17 }
  0x1a   : > { %s1750_s19 = smov 128   ;;  %s1751_s20 = smov 8  }
  0x1b   : > { %p1912_p12 = pnand %p1482_p9, %p1468_p11  ;;  %s1753_s24 = smov [#allocation7]  }
  0x1c   : > { %s467_s0 = sshll.u32 %s1753_s24, 4  ;;  %s468_s0 = int_to_ptr.vmem [resolvable:$true] %s467_s0 }
  0x1d   : > { %s442_s26 = sshll.u32 %s2192_s6, 4  ;;  %s1752_s6 = smov [#allocation2]   ;;  %s443_s26 = int_to_ptr.hbm [resolvable:$true] %s442_s26 }
  0x1e   : > { %s425_s30 = sshll.u32 %s2193_s4, 4  ;;  %s427_s21 = sshll.u32 %s1752_s6, 4  ;;  %s426_s30 = int_to_ptr.hbm [resolvable:$true] %s425_s30  ;;  %s428_s21 = int_to_ptr.vmem [resolvable:$true] %s427_s21 }
  0x1f   : > { %1474 = dma.hbm_to_vmem [thread:$0]  (!%p1912_p12), %s443_s26, 512, %s445_s17, [#allocation6], %s1750_s19, %s1750_s19, %s1751_s20  }
  0x20   : > { %s465_s4 = sshll.u32 %s2164_s10, 4  ;;  %514 = sbr.rel (%p1898_p10) target bundleno = 2404 (0x964), region = 84  ;;  %s466_s4 = int_to_ptr.hbm [resolvable:$true] %s465_s4 }
  0x21   : > { %1471 = dma.hbm_to_vmem [thread:$0]  (!%p1912_p12), %s426_s30, 512, %s428_s21, [#allocation3], %s1750_s19, %s1750_s19, %s1751_s20  }
  0x22   : > { %1477 = dma.hbm_to_vmem [thread:$0]  (!%p1912_p12), %s466_s4, 512, %s468_s0, [#allocation6], %s1750_s19, %s1750_s19, %s1751_s20  }
  0x25   : > { %1722 = dma.done.wait (%p1482_p9), [#allocation3], 512  }
  0x26   : > { %1724 = vsyncadd (%p1482_p9), [#allocation3], 4294966784 }
  0x27   : > { %1726 = dma.done.wait (%p1482_p9), [#allocation6], 1024  }
  0x28   : > { %1728 = vsyncadd (%p1482_p9), [#allocation6], 4294966272  ;;  %p580_p13 = scmp.lt.s32.totalorder %s1870_s25, 1  ;;  %s2195_s24 = sld [smem:[#allocation19_spill]]  ;;  %v599_v0 = vld [vmem:[%s2156_s2 + $0x10] sm:$0xff]  ;;  %v600_v1 = vld [vmem:[%s2156_s2 + $0x18] sm:$0xff] }
  0x29   : > { %v597_v2 = vld [vmem:[%s2156_s2] sm:$0xff]  ;;  %v603_v3 = vpack.c.bf16 %v600_v1, %v599_v0  ;;  %v598_v4 = vld [vmem:[%s2156_s2 + $0x8] sm:$0xff]  ;;  %v628_v9 = vld [vmem:[#allocation2 + $0x10] sm:$0xff]  ;;  %vm608_vm0 = vcmask 261120   ;;  %s1756_s30 = smov 72   ;;  %s1757_s0 = smov 120  }
  0x2a   : > { %s581_s6 = scalar_select %p580_p13, %s1870_s25, 1  ;;  %v602_v10 = vpack.c.bf16 %v598_v4, %v597_v2  ;;  %v629_v13 = vld [vmem:[#allocation2 + $0x18] sm:$0xff]  ;;  %v626_v16 = vld [vmem:[#allocation2] sm:$0xff]  ;;  %v627_v17 = vld [vmem:[#allocation2 + $0x8] sm:$0xff]  ;;  %vm660_vm1 = vcmask 64512   ;;  %vm830_vm2 = vcmask 1043456  }
  0x2b   : > { %618 = vmatpush.bf16.msra.mxu0 %v603_v3  ;;  %v632_v14 = vpack.c.bf16 %v629_v13, %v628_v9  ;;  %v631_v18 = vpack.c.bf16 %v627_v17, %v626_v16  ;;  %v1536_v21 = vld [vmem:[%s2157_s3] ss:$0 sm:$0xff]  ;;  %s1759_s18 = smov 112   ;;  %vm694_vm3 = vcmask 130048   ;;  %s1760_s20 = smov 104   ;;  %vm1204_vm11 = vcmask 523264  }
  0x2c   : > { %s1451_s4 = sshll.u32 %s581_s6, 4  ;;  %v1537_v26 = vld [vmem:[%s2159_s5] ss:$0 sm:$0xff]  ;;  %s1453_s6 = sshll.u32 %s1870_s25, 4 }
  0x2d   : > { %s589_s17 = scalar_lea.vmem %s2155_s1, %s1451_s4  ;;  %646 = vmatpush.bf16.msra.mxu1 %v632_v14  ;;  %v736_v32 = vld [vmem:[#allocation5] sm:$0xff]  ;;  %s1294_s23 = scalar_lea.hbm %s2170_s16, %s1453_s6 }
  0x2e   : > { %s584_s27 = scalar_lea.vmem %s2195_s24, %s1451_s4  ;;  %v593_v7 = vld [vmem:[%s589_s17] sm:$0xff]  ;;  %v594_v8 = vld [vmem:[%s589_s17 + $0x8] sm:$0xff]  ;;  %s1754_s24 = smov 96   ;;  %v738_v33 = vpack.c.bf16 %v736_v32, %v736_v32 }
  0x2f   : > { %v1955_v5 = vld [vmem:[%s584_s27] sm:$0xff]  ;;  %v1957_v6 = vld [vmem:[%s584_s27 + $0x8] sm:$0xff]  ;;  %619 = vmatpush.bf16.msra.mxu0 %v602_v10  ;;  %s1755_s27 = smov 88   ;;  %s1758_s17 = smov 80  }
  0x30   : > { %v595_v11 = vadd.f32 %v593_v7, %v1955_v5  ;;  %v596_v12 = vadd.f32 %v594_v8, %v1957_v6  ;;  %v630_v19 = vpack.c.bf16 %v1957_v6, %v1955_v5  ;;  %v852_v34 = vsel %vm830_vm2, %v738_v33, 0  ;;  %s1697_s28 = scalar_lea.hbm %s2170_s16, 32 }
  0x31   : > { %647 = vmatpush.bf16.msra.mxu1 %v631_v18 }
  0x32   : > { %v601_v15 = vpack.c.bf16 %v596_v12, %v595_v11 }
  0x34   : > { %1418 = vmatmul.msk.bf16.vlgmr.msra.gmra.mxu0 %vm608_vm0, %v601_v15  ;;  %1419 = vmatmul.msk.bf16.vlgmr.msra.gmra.mxu1 %vm608_vm0, %v630_v19 }
  0xb1   : > { %v621_v20 = vpop.f32.mrf.mxu0  ;;  %v649_v25 = vpop.f32.mrf.mxu1 }
  0xb2   : > { %v1968_v24 = vadd.f32 %v1536_v21, %v621_v20  ;;  %v650_v27 = vadd.f32 %v1537_v26, %v649_v25 }
  0xb9   : > { %v623_v22 = vpop.f32.mrf.mxu0  ;;  %v651_v28 = vpop.f32.mrf.mxu1 }
  0xba   : > { %v624_v23 = vadd.f32 %v1536_v21, %v623_v22  ;;  %v652_v29 = vadd.f32 %v1537_v26, %v651_v28 }
  0xbc   : > { %658 = vrot.lane.b32.xlu0 %v624_v23, %s1754_s24  ;;  %v1979_v30 = vpack.c.bf16 %v652_v29, %v650_v27 }
  0xbe   : > { %729 = vmatpush.bf16.msra.mxu3 %v1979_v30 }
  0xc4   : > { %656 = vrot.lane.b32.xlu0 %v1968_v24, %s1754_s24 }
  0xcc   : > { %745 = vrot.lane.b32.xlu0 %v624_v23, %s1755_s27 }
  0xd4   : > { %983 = vrot.lane.b32.xlu0 %v624_v23, %s1756_s30 }
  0xdc   : > { %741 = vrot.lane.b32.xlu0 %v624_v23, %s1757_s0 }
  0xe4   : > { %874 = vrot.lane.b32.xlu0 %v624_v23, %s1758_s17 }
  0xec   : > { %872 = vrot.lane.b32.xlu0 %v1968_v24, %s1758_s17 }
  0xf4   : > { %870 = vrot.lane.b32.xlu0 %v624_v23, %s1759_s18 }
 0x12e   : > { %v659_v31 = vpop.permute.xlu0 %658 }
 0x12f   : > { %1420 = vmatpush.xpose.msk.msra.mxu2 %vm660_vm1, %v659_v31 }
 0x136   : > { %v657_v35 = vpop.permute.xlu0 %656 }
 0x137   : > { %1421 = vmatpush.xpose.msk.msra.mxu2 %vm660_vm1, %v657_v35 }
 0x13a   : > { %1422 = vmatmul.msk.f32.vlgmr.msra.gmra.mxu2 %vm660_vm1, %v1968_v24 }
 0x13b   : > { %861 = vmatpush.bf16.msrb.mxu2 %v852_v34 }
 0x13e   : > { %v746_v36 = vpop.permute.xlu0 %745 }
 0x13f   : > { %1425 = vmatpush.xpose.msk.msrb.mxu3 %vm660_vm1, %v746_v36 }
 0x142   : > { %1423 = vmatmul.msk.f32.gmra.mxu2 %vm660_vm1, %v624_v23 }
 0x146   : > { %v984_v37 = vpop.permute.xlu0 %983 }
 0x147   : > { %1438 = vmatpush.xpose.msk.msra.mxu2 %vm660_vm1, %v984_v37 }
 0x14e   : > { %v742_v56 = vpop.permute.xlu0 %741 }
 0x156   : > { %v875_v59 = vpop.permute.xlu0 %874 }
 0x15e   : > { %v873_v1 = vpop.permute.xlu0 %872 }
 0x166   : > { %v871_v4 = vpop.permute.xlu0 %870 }
 0x1bd   : > { %v686_v38 = vpop.f32.mrf.mxu2 }
 0x1be   : > { %v692_v39 = vmul.f32 0.35355338, %v686_v38 }
 0x1c0   : > { %v695_v40 = vsel %vm694_vm3, %v692_v39, -inf }
 0x1c1   : > { %696 = vmax.xlane.f32.xlu1 %v695_v40 }
 0x1c5   : > { %v689_v41 = vpop.f32.mrf.mxu2 }
 0x1c6   : > { %v693_v42 = vmul.f32 0.35355338, %v689_v41 }
 0x1c8   : > { %v698_v43 = vsel %vm694_vm3, %v693_v42, -inf }
 0x1c9   : > { %699 = vmax.xlane.f32.xlu1 %v698_v43 }
 0x1e2   : > { %743 = vrot.lane.b32.xlu1 %v1968_v24, %s1755_s27 }
 0x1ea   : > { %977 = vrot.lane.b32.xlu1 %v1968_v24, %s1760_s20 }
 0x1f2   : > { %979 = vrot.lane.b32.xlu1 %v624_v23, %s1760_s20 }
 0x234   : > { %v697_v44 = vpop.xlane.xlu1 %696 }
 0x235   : > { %v701_v45 = vsub.f32 %v692_v39, %v697_v44 }
 0x237   : > { %v703_v46 = vmul.f32 1.442695, %v701_v45 }
 0x239   : > { %1545 = vpow2.f32 %v703_v46 }
 0x23c   : > { %v700_v47 = vpop.xlane.xlu1 %699 }
 0x23d   : > { %v702_v48 = vsub.f32 %v693_v42, %v700_v47 }
 0x23f   : > { %v1546_v49 = vpop.eup %1545  ;;  %v705_v50 = vmul.f32 1.442695, %v702_v48 }
 0x240   : > { %v707_v51 = vsel %vm694_vm3, %v1546_v49, 0.0 }
 0x241   : > { %1547 = vpow2.f32 %v705_v50  ;;  %708 = vadd.xlane.f32.xlu2 %v707_v51 }
 0x247   : > { %v1548_v52 = vpop.eup %1547 }
 0x248   : > { %v710_v53 = vsel %vm694_vm3, %v1548_v52, 0.0 }
 0x249   : > { %711 = vadd.xlane.f32.xlu2 %v710_v53 }
 0x254   : > { %v744_v54 = vpop.permute.xlu1 %743 }
 0x255   : > { %1426 = vmatpush.xpose.msk.msrb.mxu3 %vm660_vm1, %v744_v54 }
 0x25c   : > { %v978_v13 = vpop.permute.xlu1 %977 }
 0x261   : > { %739 = vrot.lane.b32.xlu2 %v1968_v24, %s1757_s0 }
 0x264   : > { %v980_v19 = vpop.permute.xlu1 %979 }
 0x269   : > { %981 = vrot.lane.b32.xlu2 %v1968_v24, %s1756_s30 }
 0x271   : > { %868 = vrot.lane.b32.xlu2 %v1968_v24, %s1759_s18 }
 0x2b4   : > { %v709_v55 = vpop.xlane.xlu2 %708 }
 0x2b5   : > { %1549 = vrcp.f32 %v709_v55 }
 0x2bb   : > { %v1550_v58 = vpop.eup %1549 }
 0x2bc   : > { %v712_v57 = vpop.xlane.xlu2 %711  ;;  %v715_v62 = vmul.f32 %v1550_v58, %v1546_v49 }
 0x2bd   : > { %1551 = vrcp.f32 %v712_v57 }
 0x2c3   : > { %v1552_v60 = vpop.eup %1551 }
 0x2c4   : > { %v740_v61 = vpop.permute.xlu2 %739  ;;  %v716_v63 = vmul.f32 %v1552_v60, %v1548_v52 }
 0x2c6   : > { %v717_v0 = vpack.c.bf16 %v716_v63, %v715_v62 }
 0x2c8   : > { %1424 = vmatmul.msk.bf16.vlgmr.msra.gmra.mxu3 %vm694_vm3, %v717_v0 }
 0x2c9   : > { %1432 = vmatpush.xpose.msk.msra.mxu3 %vm660_vm1, %v875_v59 }
 0x2cc   : > { %v982_v2 = vpop.permute.xlu2 %981 }
 0x2cd   : > { %1433 = vmatpush.xpose.msk.msra.mxu3 %vm660_vm1, %v873_v1  ;;  %1439 = vmatpush.xpose.msk.msra.mxu2 %vm660_vm1, %v982_v2 }
 0x2d4   : > { %v869_v3 = vpop.permute.xlu2 %868 }
 0x2d8   : > { %1427 = vmatmul.msk.f32.vlgmr.msrb.gmra.mxu3 %vm660_vm1, %v740_v61 }
 0x2e0   : > { %1428 = vmatmul.msk.f32.gmra.mxu3 %vm660_vm1, %v742_v56 }
 0x2e8   : > { %1434 = vmatmul.msk.f32.vlgmr.msra.gmra.mxu3 %vm660_vm1, %v869_v3 }
 0x2f0   : > { %1435 = vmatmul.msk.f32.gmra.mxu3 %vm660_vm1, %v871_v4 }
 0x34b   : > { %v731_v7 = vpop.f32.mrf.mxu3 }
 0x353   : > { %v733_v8 = vpop.f32.mrf.mxu3 }
 0x354   : > { %v737_v9 = vpack.c.bf16 %v733_v8, %v731_v7 }
 0x356   : > { %1431 = vmatmul.msk.bf16.vlgmr.msrb.gmra.mxu2 %vm660_vm1, %v737_v9  ;;  %v824_v9 = vld [vmem:[#allocation5 + $0x8] sm:$0xff] }
 0x35b   : > { %v772_v10 = vpop.f32.mrf.mxu3 }
 0x35c   : > { %v778_v11 = vmul.f32 0.35355338, %v772_v10  ;;  %v826_v10 = vpack.c.bf16 %v824_v9, %v824_v9 }
 0x35e   : > { %v780_v12 = vsel %vm694_vm3, %v778_v11, -inf }
 0x35f   : > { %781 = vmax.xlane.f32.xlu2 %v780_v12 }
 0x363   : > { %v775_v14 = vpop.f32.mrf.mxu3 }
 0x364   : > { %v779_v15 = vmul.f32 0.35355338, %v775_v14 }
 0x366   : > { %1440 = vmatmul.msk.f32.vlgmr.msra.gmra.mxu2 %vm660_vm1, %v978_v13  ;;  %v783_v16 = vsel %vm694_vm3, %v779_v15, -inf }
 0x367   : > { %784 = vmax.xlane.f32.xlu1 %v783_v16 }
 0x36b   : > { %v901_v17 = vpop.f32.mrf.mxu3 }
 0x36c   : > { %v907_v18 = vmul.f32 0.35355338, %v901_v17 }
 0x36e   : > { %1441 = vmatmul.msk.f32.gmra.mxu2 %vm660_vm1, %v980_v19  ;;  %v909_v20 = vsel %vm694_vm3, %v907_v18, -inf }
 0x36f   : > { %910 = vmax.xlane.f32.xlu1 %v909_v20 }
 0x373   : > { %v904_v43 = vpop.f32.mrf.mxu3 }
 0x374   : > { %v908_v44 = vmul.f32 0.35355338, %v904_v43 }
 0x376   : > { %v912_v47 = vsel %vm694_vm3, %v908_v44, -inf }
 0x3d2   : > { %v782_v25 = vpop.xlane.xlu2 %781 }
 0x3d3   : > { %v786_v27 = vsub.f32 %v778_v11, %v782_v25  ;;  %v832_v11 = vsel %vm830_vm2, %v826_v10, 0 }
 0x3d4   : > { %841 = vmatpush.bf16.msrb.mxu1 %v832_v11 }
 0x3d5   : > { %v788_v31 = vmul.f32 1.442695, %v786_v27 }
 0x3d9   : > { %v2020_v21 = vpop.f32.mrf.mxu2 }
 0x3da   : > { %v785_v22 = vpop.xlane.xlu1 %784 }
 0x3db   : > { %v787_v23 = vsub.f32 %v779_v15, %v785_v22 }
 0x3dd   : > { %v790_v24 = vmul.f32 1.442695, %v787_v23 }
 0x3df   : > { %1553 = vpow2.f32 %v790_v24 }
 0x3e0   : > { %1555 = vpow2.f32 %v788_v31 }
 0x3e1   : > { %v2022_v26 = vpop.f32.mrf.mxu2 }
 0x3e2   : > { %v911_v32 = vpop.xlane.xlu1 %910 }
 0x3e3   : > { %v915_v35 = vsub.f32 %v907_v18, %v911_v32 }
 0x3e5   : > { %v1554_v28 = vpop.eup %1553  ;;  %v917_v37 = vmul.f32 1.442695, %v915_v35 }
 0x3e6   : > { %v795_v29 = vsel %vm694_vm3, %v1554_v28, 0.0  ;;  %v1556_v38 = vpop.eup %1555 }
 0x3e7   : > { %796 = vadd.xlane.f32.xlu1 %v795_v29  ;;  %1557 = vpow2.f32 %v917_v37  ;;  %v792_v41 = vsel %vm694_vm3, %v1556_v38, 0.0 }
 0x3e9   : > { %v1010_v33 = vpop.f32.mrf.mxu2 }
 0x3ea   : > { %v1016_v34 = vmul.f32 0.35355338, %v1010_v33  ;;  %v1061_v33 = vld [vmem:[#allocation5 + $0x18] sm:$0xff] }
 0x3ec   : > { %v1018_v36 = vsel %vm694_vm3, %v1016_v34, -inf }
 0x3ed   : > { %1019 = vmax.xlane.f32.xlu0 %v1018_v36  ;;  %v2028_v45 = vpop.eup %1557  ;;  %v952_v36 = vld [vmem:[#allocation5 + $0x10] sm:$0xff] }
 0x3ee   : > { %v921_v46 = vsel %vm694_vm3, %v2028_v45, 0.0  ;;  %v954_v37 = vpack.c.bf16 %v952_v36, %v952_v36 }
 0x3f1   : > { %v1013_v39 = vpop.f32.mrf.mxu2 }
 0x3f2   : > { %v1017_v40 = vmul.f32 0.35355338, %v1013_v39 }
 0x3f4   : > { %v1021_v42 = vsel %vm694_vm3, %v1017_v40, -inf }
 0x3f5   : > { %793 = vadd.xlane.f32.xlu0 %v792_v41  ;;  %1022 = vmax.xlane.f32.xlu2 %v1021_v42 }
 0x3fd   : > { %922 = vadd.xlane.f32.xlu0 %v921_v46  ;;  %913 = vmax.xlane.f32.xlu2 %v912_v47 }
 0x415   : > { %804 = vrot.lane.b32.xlu2 %v1979_v30, %s1757_s0  ;;  %s1297_s0 = sshll.u32 %s1294_s23, 4  ;;  %s1298_s0 = int_to_ptr.hbm [resolvable:$true] %s1297_s0 }
 0x416   : > { %s1691_s17 = sshra.s32 %s1298_s0, 4  ;;  %s1692_s17 = int_to_ptr.hbm [resolvable:$true] %s1691_s17 }
 0x417   : > { %s1693_s26 = scalar_lea.hbm %s1692_s17, 16  ;;  %p1698_p3 = scmp.lt.s32.totalorder %s1692_s17, %s2170_s16 }
 0x418   : > { %p1694_p0 = scmp.ne.s32.totalorder %s1692_s17, %s1693_s26  ;;  %p1699_p4 = scmp.lt.s32.totalorder %s1697_s28, %s1693_s26 }
 0x41a   : > { %p1695_p1 = pnand %p1694_p0, %p1887_p5  ;;  %p1700_p7 = por %p1699_p4, %p1698_p3 }
 0x41c   : > { %p1696_p2 = pneg %p1695_p1 }
 0x41e   : > { %p1701_p8 = pnand %p1700_p7, %p1696_p2 }
 0x45a   : > { %v797_v54 = vpop.xlane.xlu1 %796 }
 0x460   : > { %v1020_v48 = vpop.xlane.xlu0 %1019 }
 0x461   : > { %v1024_v49 = vsub.f32 %v1016_v34, %v1020_v48  ;;  %v1063_v34 = vpack.c.bf16 %v1061_v33, %v1061_v33 }
 0x463   : > { %v1026_v50 = vmul.f32 1.442695, %v1024_v49  ;;  %v1068_v35 = vsel %vm830_vm2, %v1063_v34, 0 }
 0x465   : > { %1559 = vpow2.f32 %v1026_v50 }
 0x468   : > { %v1023_v51 = vpop.xlane.xlu2 %1022  ;;  %v794_v52 = vpop.xlane.xlu0 %793 }
 0x469   : > { %1561 = vrcp.f32 %v794_v52  ;;  %v1025_v59 = vsub.f32 %v1017_v40, %v1023_v51  ;;  %v1538_v51 = vld [vmem:[%s2161_s7] ss:$0 sm:$0xff] }
 0x46a   : > { %1563 = vrcp.f32 %v797_v54 }
 0x46b   : > { %v1560_v53 = vpop.eup %1559  ;;  %v1028_v63 = vmul.f32 1.442695, %v1025_v59 }
 0x46c   : > { %v1030_v55 = vsel %vm694_vm3, %v1560_v53, 0.0 }
 0x46d   : > { %1031 = vadd.xlane.f32.xlu0 %v1030_v55 }
 0x46f   : > { %v1562_v58 = vpop.eup %1561 }
 0x470   : > { %v914_v56 = vpop.xlane.xlu2 %913  ;;  %v1564_v61 = vpop.eup %1563  ;;  %v800_v62 = vmul.f32 %v1562_v58, %v1556_v38  ;;  %v959_v38 = vsel %vm830_vm2, %v954_v37, 0 }
 0x471   : > { %v916_v57 = vsub.f32 %v908_v44, %v914_v56  ;;  %v801_v0 = vmul.f32 %v1564_v61, %v1554_v28  ;;  %v923_v12 = vpop.xlane.xlu0 %922  ;;  %968 = vmatpush.bf16.msra.mxu1 %v959_v38 }
 0x473   : > { %v919_v60 = vmul.f32 1.442695, %v916_v57  ;;  %v802_v2 = vpack.c.bf16 %v801_v0, %v800_v62 }
 0x475   : > { %1565 = vpow2.f32 %v919_v60 }
 0x476   : > { %1567 = vpow2.f32 %v1028_v63  ;;  %v1761_v63 = vmov 32.0  }
 0x478   : > { %v805_v1 = vpop.permute.xlu2 %804 }
 0x479   : > { %817 = vmatpush.bf16.msrb.mxu0 %v805_v1 }
 0x47b   : > { %v1566_v3 = vpop.eup %1565 }
 0x47c   : > { %1429 = vmatmul.msk.bf16.vlgmr.msrb.gmra.mxu0 %vm694_vm3, %v802_v2  ;;  %v924_v4 = vsel %vm694_vm3, %v1566_v3, 0.0  ;;  %v1568_v7 = vpop.eup %1567 }
 0x47d   : > { %925 = vadd.xlane.f32.xlu1 %v924_v4  ;;  %v1033_v8 = vsel %vm694_vm3, %v1568_v7, 0.0 }
 0x481   : > { %1041 = vrot.lane.b32.xlu0 %v1979_v30, %s1760_s20 }
 0x485   : > { %1034 = vadd.xlane.f32.xlu1 %v1033_v8 }
 0x49e   : > { %932 = vrot.lane.b32.xlu1 %v1979_v30, %s1759_s18  ;;  %s577_s18 = sand.u32 1, %s1739_s22  }
 0x49f   : > { %s1413_s29 = sshll.u32 %s577_s18, 4  ;;  %s1283_s25 = scalar_lea.sflag [#allocation4], %s577_s18 }
 0x4a0   : > { %s579_s24 = scalar_lea.vmem [#allocation8], %s1413_s29 }
 0x4a1   : > { %s1295_s30 = sshll.u32 %s579_s24, 4  ;;  %s1296_s30 = int_to_ptr.vmem [resolvable:$true] %s1295_s30 }
 0x4e0   : > { %v1032_v13 = vpop.xlane.xlu0 %1031 }
 0x4e1   : > { %1569 = vrcp.f32 %v1032_v13 }
 0x4e7   : > { %v1570_v18 = vpop.eup %1569 }
 0x4e8   : > { %v1038_v20 = vmul.f32 %v1570_v18, %v1560_v53 }
 0x4f0   : > { %v926_v14 = vpop.xlane.xlu1 %925 }
 0x4f3   : > { %v1042_v15 = vpop.permute.xlu0 %1041 }
 0x4f4   : > { %1054 = vmatpush.bf16.msrb.mxu3 %v1042_v15  ;;  %v1159_v15 = vld [vmem:[#allocation7 + $0x10] sm:$0xff] }
 0x4f8   : > { %v1035_v16 = vpop.xlane.xlu1 %1034 }
 0x4f9   : > { %1571 = vrcp.f32 %v1035_v16  ;;  %v819_v17 = vpop.f32.mrf.mxu0  ;;  %v1160_v16 = vld [vmem:[#allocation7 + $0x18] sm:$0xff] }
 0x4fa   : > { %1573 = vrcp.f32 %v926_v14 }
 0x4fb   : > { %1575 = vrcp.f32 %v923_v12 }
 0x4fc   : > { %1577 = vrcp.f32 %v1761_v63 }
 0x4ff   : > { %v1572_v19 = vpop.eup %1571 }
 0x500   : > { %v1039_v22 = vmul.f32 %v1572_v19, %v1568_v7  ;;  %v1574_v25 = vpop.eup %1573 }
 0x501   : > { %v821_v23 = vpop.f32.mrf.mxu0  ;;  %v1576_v27 = vpop.eup %1575  ;;  %v930_v28 = vmul.f32 %v1574_v25, %v1566_v3 }
 0x502   : > { %v1040_v30 = vpack.c.bf16 %v1039_v22, %v1038_v20  ;;  %v825_v24 = vpack.c.bf16 %v821_v23, %v819_v17  ;;  %v929_v29 = vmul.f32 %v1576_v27, %v2028_v45  ;;  %v1578_v0 = vpop.eup %1577  ;;  %v1163_v17 = vpack.c.bf16 %v1160_v16, %v1159_v15  ;;  %v1157_v20 = vld [vmem:[#allocation7] sm:$0xff]  ;;  %v1158_v22 = vld [vmem:[#allocation7 + $0x8] sm:$0xff] }
 0x503   : > { %v1101_v1 = vmul.f32 32.0, %v1578_v0  ;;  %vm1105_vm4 = vweird.f32 %v1578_v0 }
 0x504   : > { %1430 = vmatmul.msk.bf16.vlgmr.msrb.gmra.mxu1 %vm660_vm1, %v825_v24  ;;  %1442 = vmatmul.msk.bf16.vlgmr.msrb.gmra.mxu3 %vm694_vm3, %v1040_v30  ;;  %v931_v32 = vpack.c.bf16 %v930_v28, %v929_v29  ;;  %v1162_v30 = vpack.c.bf16 %v1158_v22, %v1157_v20 }
 0x505   : > { %1177 = vmatpush.bf16.msrb.mxu1 %v1163_v17 }
 0x509   : > { %1178 = vmatpush.bf16.msrb.mxu1 %v1162_v30 }
 0x510   : > { %v933_v31 = vpop.permute.xlu1 %932 }
 0x511   : > { %945 = vmatpush.bf16.msra.mxu0 %v933_v31 }
 0x514   : > { %1436 = vmatmul.msk.bf16.vlgmr.msra.gmra.mxu0 %vm694_vm3, %v931_v32 }
 0x515   : > { %1077 = vmatpush.bf16.msrb.mxu0 %v1068_v35 }
 0x581   : > { %v843_v45 = vpop.f32.mrf.mxu1 }
 0x582   : > { %v864_v47 = vadd.f32 %v2020_v21, %v843_v45  ;;  %v1540_v45 = vld [vmem:[%s2163_s9] ss:$0 sm:$0xff] }
 0x587   : > { %v1056_v39 = vpop.f32.mrf.mxu3 }
 0x589   : > { %v845_v46 = vpop.f32.mrf.mxu1 }
 0x58a   : > { %v866_v54 = vadd.f32 %v2022_v26, %v845_v46  ;;  %v1102_v26 = vsub.f32 1.0, %v1101_v1 }
 0x58c   : > { %v1103_v2 = vmul.f32 %v1578_v0, %v1102_v26 }
 0x58f   : > { %v1058_v40 = vpop.f32.mrf.mxu3 }
 0x590   : > { %v1062_v41 = vpack.c.bf16 %v1058_v40, %v1056_v39 }
 0x591   : > { %v947_v42 = vpop.f32.mrf.mxu0 }
 0x592   : > { %1443 = vmatmul.msk.bf16.vlgmr.msrb.gmra.mxu0 %vm660_vm1, %v1062_v41  ;;  %v1539_v41 = vld [vmem:[%s2162_s8] ss:$0 sm:$0xff] }
 0x599   : > { %v949_v43 = vpop.f32.mrf.mxu0 }
 0x59a   : > { %v953_v44 = vpack.c.bf16 %v949_v43, %v947_v42 }
 0x59c   : > { %1437 = vmatmul.msk.bf16.vlgmr.msra.gmra.mxu1 %vm660_vm1, %v953_v44 }
 0x60f   : > { %v1079_v48 = vpop.f32.mrf.mxu0 }
 0x617   : > { %v1081_v59 = vpop.f32.mrf.mxu0 }
 0x619   : > { %v970_v49 = vpop.f32.mrf.mxu1 }
 0x61a   : > { %v975_v50 = vadd.f32 %v970_v49, %v864_v47 }
 0x61c   : > { %v1084_v52 = vadd.f32 %v1079_v48, %v975_v50 }
 0x61e   : > { %v1090_v53 = vadd.f32 %v1538_v51, %v1084_v52  ;;  %v1193_v52 = vld [vmem:[%s2166_s12 + $0x30] sm:$0xff] }
 0x620   : > { %v1092_v55 = vadd.f32 %v1090_v53, %v1955_v5  ;;  %v1104_v5 = vadd.f32 %v1578_v0, %v1103_v2  ;;  %v1194_v53 = vld [vmem:[%s2166_s12 + $0x38] sm:$0xff] }
 0x621   : > { %v972_v56 = vpop.f32.mrf.mxu1 }
 0x622   : > { %v976_v57 = vadd.f32 %v972_v56, %v866_v54  ;;  %v1094_v58 = vsel %vm608_vm0, %v1092_v55, 0.0  ;;  %v2061_v3 = vsel %vm1105_vm4, %v1578_v0, %v1104_v5  ;;  %v1199_v54 = vpack.c.bf16 %v1194_v53, %v1193_v52  ;;  %v1192_v56 = vld [vmem:[%s2166_s12 + $0x28] sm:$0xff]  ;;  %v1541_v0 = vld [vmem:[%s2165_s11] ss:$0 sm:$0xff] }
 0x623   : > { %1095 = vadd.xlane.f32.xlu2 %v1094_v58  ;;  %v1189_v58 = vld [vmem:[%s2166_s12 + $0x10] sm:$0xff] }
 0x624   : > { %v1085_v21 = vadd.f32 %v1081_v59, %v976_v57  ;;  %1212 = vmatpush.bf16.msrb.mxu2 %v1199_v54  ;;  %v1190_v59 = vld [vmem:[%s2166_s12 + $0x18] sm:$0xff] }
 0x626   : > { %v1091_v60 = vadd.f32 %v1538_v51, %v1085_v21  ;;  %v1197_v21 = vpack.c.bf16 %v1190_v59, %v1189_v58 }
 0x628   : > { %v1093_v61 = vadd.f32 %v1091_v60, %v1957_v6  ;;  %v1187_v60 = vld [vmem:[%s2166_s12] sm:$0xff] }
 0x62a   : > { %v1097_v62 = vsel %vm608_vm0, %v1093_v61, 0.0 }
 0x62b   : > { %1098 = vadd.xlane.f32.xlu0 %v1097_v62 }
 0x696   : > { %v1096_v4 = vpop.xlane.xlu2 %1095 }
 0x697   : > { %v1107_v7 = vmul.f32 %v2061_v3, %v1096_v4 }
 0x699   : > { %v1109_v8 = vsub.f32 %v1092_v55, %v1107_v7  ;;  %v1191_v55 = vld [vmem:[%s2166_s12 + $0x20] sm:$0xff] }
 0x69a   : > { %v1198_v57 = vpack.c.bf16 %v1192_v56, %v1191_v55 }
 0x69b   : > { %v1111_v9 = vmul.f32 %v1109_v8, %v1109_v8 }
 0x69c   : > { %1213 = vmatpush.bf16.msrb.mxu2 %v1198_v57 }
 0x69d   : > { %v1113_v6 = vsel %vm608_vm0, %v1111_v9, 0.0 }
 0x69e   : > { %1114 = vadd.xlane.f32.xlu1 %v1113_v6  ;;  %v1099_v10 = vpop.xlane.xlu0 %1098 }
 0x69f   : > { %v1108_v11 = vmul.f32 %v2061_v3, %v1099_v10 }
 0x6a0   : > { %1214 = vmatpush.bf16.msrb.mxu2 %v1197_v21 }
 0x6a1   : > { %v1110_v12 = vsub.f32 %v1093_v61, %v1108_v11  ;;  %v1188_v61 = vld [vmem:[%s2166_s12 + $0x8] sm:$0xff] }
 0x6a2   : > { %v1196_v62 = vpack.c.bf16 %v1188_v61, %v1187_v60 }
 0x6a3   : > { %v1112_v13 = vmul.f32 %v1110_v12, %v1110_v12 }
 0x6a4   : > { %1215 = vmatpush.bf16.msrb.mxu2 %v1196_v62 }
 0x6a5   : > { %v1116_v14 = vsel %vm608_vm0, %v1112_v13, 0.0 }
 0x6a6   : > { %1117 = vadd.xlane.f32.xlu2 %v1116_v14 }
 0x711   : > { %v1115_v18 = vpop.xlane.xlu1 %1114 }
 0x712   : > { %v1119_v19 = vmul.f32 %v1115_v18, %v2061_v3 }
 0x714   : > { %v1121_v23 = vadd.f32 1e-05, %v1119_v19 }
 0x716   : > { %1579 = vrsqrt.f32 %v1121_v23  ;;  %vm1129_vm6 = vweird.f32 %v1121_v23 }
 0x719   : > { %v1118_v24 = vpop.xlane.xlu2 %1117 }
 0x71a   : > { %v1120_v25 = vmul.f32 %v1118_v24, %v2061_v3 }
 0x71c   : > { %v1580_v27 = vpop.eup %1579  ;;  %v1122_v28 = vadd.f32 1e-05, %v1120_v25 }
 0x71d   : > { %v1124_v29 = vmul.f32 %v1580_v27, %v1121_v23  ;;  %vm1130_vm5 = vweird.f32 %v1580_v27 }
 0x71e   : > { %1581 = vrsqrt.f32 %v1122_v28  ;;  %vm1131_vm7 = vmor %vm1129_vm6, %vm1130_vm5  ;;  %vm1139_vm9 = vweird.f32 %v1122_v28 }
 0x71f   : > { %v1125_v31 = vmul.f32 %v1580_v27, %v1124_v29 }
 0x721   : > { %v1126_v32 = vmul.f32 0.5, %v1125_v31 }
 0x723   : > { %v1127_v33 = vsub.f32 1.5, %v1126_v32 }
 0x724   : > { %v1582_v34 = vpop.eup %1581 }
 0x725   : > { %v1128_v35 = vmul.f32 %v1580_v27, %v1127_v33  ;;  %v1134_v36 = vmul.f32 %v1582_v34, %v1122_v28  ;;  %vm1140_vm8 = vweird.f32 %v1582_v34 }
 0x726   : > { %vm1141_vm10 = vmor %vm1139_vm9, %vm1140_vm8 }
 0x727   : > { %v1135_v37 = vmul.f32 %v1582_v34, %v1134_v36  ;;  %v1132_v38 = vsel %vm1131_vm7, %v1580_v27, %v1128_v35 }
 0x728   : > { %v1143_v42 = vmul.f32 %v1132_v38, %v1109_v8  ;;  %v1542_v8 = vld [vmem:[%s2167_s13] ss:$0 sm:$0xff] }
 0x729   : > { %v1136_v39 = vmul.f32 0.5, %v1135_v37 }
 0x72a   : > { %v1149_v46 = vmul.f32 %v1539_v41, %v1143_v42  ;;  %v1543_v42 = vld [vmem:[%s2168_s14] ss:$0 sm:$0xff] }
 0x72b   : > { %v1137_v40 = vsub.f32 1.5, %v1136_v39 }
 0x72c   : > { %v1155_v49 = vadd.f32 %v1540_v45, %v1149_v46 }
 0x72d   : > { %v1138_v43 = vmul.f32 %v1582_v34, %v1137_v40 }
 0x72f   : > { %v1142_v44 = vsel %vm1141_vm10, %v1582_v34, %v1138_v43 }
 0x730   : > { %v1144_v47 = vmul.f32 %v1142_v44, %v1110_v12  ;;  %v1544_v44 = vld [vmem:[%s2169_s15] ss:$0 sm:$0xff] }
 0x732   : > { %v1150_v48 = vmul.f32 %v1539_v41, %v1144_v47 }
 0x734   : > { %v1156_v50 = vadd.f32 %v1540_v45, %v1150_v48 }
 0x736   : > { %v1161_v51 = vpack.c.bf16 %v1156_v50, %v1155_v49 }
 0x738   : > { %1444 = vmatmul.msk.bf16.vlgmr.msrb.gmra.mxu1 %vm608_vm0, %v1161_v51 }
 0x7b5   : > { %v1180_v63 = vpop.f32.mrf.mxu1 }
 0x7b6   : > { %v1181_v1 = vadd.f32 %v1541_v0, %v1180_v63 }
 0x7b8   : > { %v1185_v5 = vmax.f32 %v1181_v1, 0.0 }
 0x7bd   : > { %v1182_v26 = vpop.f32.mrf.mxu1 }
 0x7be   : > { %v1183_v2 = vadd.f32 %v1541_v0, %v1182_v26 }
 0x7c0   : > { %v1186_v4 = vmax.f32 %v1183_v2, 0.0 }
 0x7c2   : > { %v1195_v7 = vpack.c.bf16 %v1186_v4, %v1185_v5 }
 0x7c4   : > { %1445 = vmatmul.msk.bf16.vlgmr.msrb.gmra.mxu2 %vm1204_vm11, %v1195_v7 }
 0x847   : > { %v1217_v9 = vpop.f32.mrf.mxu2 }
 0x848   : > { %v1218_v6 = vadd.f32 %v1542_v8, %v1217_v9 }
 0x84a   : > { %v1222_v10 = vadd.f32 %v1218_v6, %v1155_v49 }
 0x84c   : > { %v1224_v11 = vsel %vm608_vm0, %v1222_v10, 0.0 }
 0x84d   : > { %1225 = vadd.xlane.f32.xlu2 %v1224_v11 }
 0x84f   : > { %v1219_v12 = vpop.f32.mrf.mxu2 }
 0x850   : > { %v1220_v13 = vadd.f32 %v1542_v8, %v1219_v12 }
 0x852   : > { %v1223_v14 = vadd.f32 %v1220_v13, %v1156_v50 }
 0x854   : > { %v1227_v15 = vsel %vm608_vm0, %v1223_v14, 0.0 }
 0x855   : > { %1228 = vadd.xlane.f32.xlu0 %v1227_v15 }
 0x8c0   : > { %v1226_v16 = vpop.xlane.xlu2 %1225 }
 0x8c1   : > { %v1230_v17 = vmul.f32 %v1226_v16, %v2061_v3 }
 0x8c3   : > { %v1232_v18 = vsub.f32 %v1222_v10, %v1230_v17 }
 0x8c5   : > { %v1234_v19 = vmul.f32 %v1232_v18, %v1232_v18 }
 0x8c7   : > { %v1236_v20 = vsel %vm608_vm0, %v1234_v19, 0.0 }
 0x8c8   : > { %v1229_v22 = vpop.xlane.xlu0 %1228  ;;  %1237 = vadd.xlane.f32.xlu2 %v1236_v20 }
 0x8c9   : > { %v1231_v23 = vmul.f32 %v1229_v22, %v2061_v3 }
 0x8cb   : > { %v1233_v30 = vsub.f32 %v1223_v14, %v1231_v23 }
 0x8cd   : > { %v1235_v24 = vmul.f32 %v1233_v30, %v1233_v30 }
 0x8cf   : > { %v1239_v25 = vsel %vm608_vm0, %v1235_v24, 0.0 }
 0x8d0   : > { %1240 = vadd.xlane.f32.xlu1 %v1239_v25 }
 0x93b   : > { %v1238_v27 = vpop.xlane.xlu2 %1237 }
 0x93c   : > { %v1242_v28 = vmul.f32 %v1238_v27, %v2061_v3 }
 0x93e   : > { %v1244_v29 = vadd.f32 1e-05, %v1242_v28 }
 0x940   : > { %1583 = vrsqrt.f32 %v1244_v29  ;;  %vm1252_vm13 = vweird.f32 %v1244_v29 }
 0x943   : > { %v1241_v31 = vpop.xlane.xlu1 %1240 }
 0x944   : > { %v1243_v32 = vmul.f32 %v1241_v31, %v2061_v3 }
 0x946   : > { %v1584_v33 = vpop.eup %1583  ;;  %v1245_v34 = vadd.f32 1e-05, %v1243_v32 }
 0x947   : > { %v1247_v35 = vmul.f32 %v1584_v33, %v1244_v29  ;;  %vm1253_vm12 = vweird.f32 %v1584_v33 }
 0x948   : > { %1585 = vrsqrt.f32 %v1245_v34  ;;  %vm1254_vm14 = vmor %vm1252_vm13, %vm1253_vm12  ;;  %vm1262_vm1 = vweird.f32 %v1245_v34 }
 0x949   : > { %v1248_v36 = vmul.f32 %v1584_v33, %v1247_v35 }
 0x94b   : > { %v1249_v37 = vmul.f32 0.5, %v1248_v36 }
 0x94d   : > { %v1250_v38 = vsub.f32 1.5, %v1249_v37 }
 0x94e   : > { %v1586_v39 = vpop.eup %1585 }
 0x94f   : > { %v1251_v40 = vmul.f32 %v1584_v33, %v1250_v38  ;;  %v1257_v41 = vmul.f32 %v1586_v39, %v1245_v34  ;;  %vm1263_vm15 = vweird.f32 %v1586_v39 }
 0x950   : > { %vm1264_vm2 = vmor %vm1262_vm1, %vm1263_vm15 }
 0x951   : > { %v1255_v3 = vsel %vm1254_vm14, %v1584_v33, %v1251_v40  ;;  %v1258_v43 = vmul.f32 %v1586_v39, %v1257_v41 }
 0x952   : > { %v1266_v45 = vmul.f32 %v1255_v3, %v1232_v18 }
 0x953   : > { %v1259_v46 = vmul.f32 0.5, %v1258_v43 }
 0x954   : > { %v1272_v47 = vmul.f32 %v1543_v42, %v1266_v45 }
 0x955   : > { %v1260_v48 = vsub.f32 1.5, %v1259_v46 }
 0x956   : > { %v1278_v49 = vadd.f32 %v1544_v44, %v1272_v47 }
 0x957   : > { %v1261_v50 = vmul.f32 %v1586_v39, %v1260_v48 }
 0x958   : > { %1280 = vst.msk [vmem:[%s579_s24] sm:$0xff] %vm608_vm0, %v1278_v49 }
 0x959   : > { %v1265_v51 = vsel %vm1264_vm2, %v1586_v39, %v1261_v50 }
 0x95a   : > { %v1267_v52 = vmul.f32 %v1265_v51, %v1233_v30 }
 0x95c   : > { %v1273_v53 = vmul.f32 %v1543_v42, %v1267_v52 }
 0x95e   : > { %v1279_v54 = vadd.f32 %v1544_v44, %v1273_v53 }
 0x960   : > { %1281 = vst.msk [vmem:[%s579_s24 + $0x8] sm:$0xff] %vm608_vm0, %v1279_v54 }
 0x961   : > { %1704 = shalt.err (!%p1701_p8)
}
 0x962   : > { %s1762_s18 = smov 128   ;;  %s1763_s21 = smov 8  }
 0x963   : > { %1466 = dma.vmem_to_hbm [thread:$0]  (%p1887_p5), %s1296_s30, 256, %s1298_s0, %s1283_s25, %s1762_s18, %s1762_s18, %s1763_s21  }
 0x964 PF: > { %s2197_s4 = sld [smem:[#allocation14_spill]] }
 0x965   : > { %s2198_s23 = sld [smem:[#allocation12_spill]] }
 0x96a   : > { %p1488_p9 = scmp.ge.s32.totalorder %s2197_s4, 2 }
 0x96b   : > { %s1312_s19 = sand.u32 1, %s2198_s23  }
 0x96c   : > { %p1479_p10 = pnand %p1488_p9, %p1891_p6  ;;  %s1313_s20 = scalar_lea.sflag [#allocation4], %s1312_s19 }
 0x96e   : > { %p1480_p11 = pneg %p1479_p10 }
 0x970   : > { %1730 = dma.done.wait (%p1480_p11), %s1313_s20, 256  }
 0x971   : > { %1732 = vsyncadd (%p1480_p11), %s1313_s20, 4294967040  ;;  %s2200_s24 = sld [smem:[#allocation15_spill]]  ;;  %s2203_s21 = smov %s1739_s22 }
 0x972   : > { %s2201_s17 = sld [smem:[#allocation13_spill]] }
 0x973   : > { %s2202_s23 = sld [smem:[#allocation16_spill]] }
 0x977   : > { %p28_p12 = scmp.ge.s32.totalorder %s2200_s24, 4  }
 0x978   : > { %s2204_s22 = smov %s2201_s17 }
 0x979   :  { %30 = sbr.rel (!%p28_p12) target bundleno = 9 (0x9), region = 135 }
 0x97e   :  { %1319 = vsyncpa [#allocation3], 1 }
 0x97f   :  { %1321 = vsyncpa [#allocation3 + $0x1], 1 }
 0x980   :  { %1322 = vsyncpa [#allocation6], 1 }
 0x981   :  { %1323 = vsyncpa [#allocation4], 1 }
 0x982   :  { %1325 = vsyncpa [#allocation4 + $0x1], 1 }

</bundles_post_ra>
